<compile_context>
chip_gen: v5e
topology: v5e:2x2
jax: 0.10.0
libtpu: 0.0.40
codegen_flags: <defaults>
</compile_context>

<pallas_src>
import jax
import jax.numpy as jnp
from jax import lax
from jax.experimental import pallas as pl
from jax.experimental.pallas import tpu as pltpu


def _round_up(v: int, m: int) -> int:
    return ((v + m - 1) // m) * m


def _unpool_kernel(s_ref, xs_ref, out_ref):
    # out = s @ ((s^T s)^-1 @ x) : one MXU dot per tile, f32 accumulation.
    out_ref[...] = jnp.dot(
        s_ref[...], xs_ref[...], preferred_element_type=jnp.float32
    ).astype(out_ref.dtype)


def unpool(x, a, s):
    """JAX/Pallas equivalent of UnPool.forward: returns (pinv(s).T @ x, a)."""
    # Static-shape branch, mirrors `if s.size(0) < s.size(1): s = s.T`.
    if s.shape[0] < s.shape[1]:
        s = s.T
    N, K = s.shape
    K2, F = x.shape
    assert K == K2, (s.shape, x.shape)
    out_dtype = x.dtype

    # Fold the pseudo-inverse's (K,K) factor into x once, outside the kernel:
    #   pinv(s)^T @ x == s @ (s^T s)^-1 @ x
    sf = s.astype(jnp.float32)
    gram = lax.dot_general(  # (K, K) = s^T s, no transpose materialized
        sf, sf, (((0,), (0,)), ((), ())), precision=lax.Precision.HIGHEST
    )
    # TODO(synk): torch.linalg.pinv uses an SVD with singular-value cutoff;
    # this normal-equations solve assumes full column rank of s (typical for
    # cluster-assignment matrices) and has no clean Pallas equivalent.
    xs = jnp.linalg.solve(gram, x.astype(jnp.float32))  # (K, F), f32

    # ---- Tile selection: big, lane-dense tiles, no padding of the arrays. ----
    tm = N if N <= 512 else 512          # multiple of 8 or full dim
    tn = F if F <= 2048 else 2048        # multiple of 128 or full dim

    def _footprint(tm_, tn_):
        # Double-buffered VMEM estimate (with lane/sublane padding).
        tm_p = _round_up(tm_, 8)
        tn_p = _round_up(tn_, 128)
        k_lane = _round_up(K, 128)
        k_sub = _round_up(K, 8)
        out_b = tm_p * tn_p * jnp.dtype(out_dtype).itemsize
        s_b = tm_p * k_lane * s.dtype.itemsize
        x_b = k_sub * tn_p * 4
        return 2 * (out_b + s_b + x_b)

    budget = 20 << 20  # stays well inside v7x's 64 MiB VMEM / 32 MiB scoped
    while _footprint(tm, tn) > budget and tn > 256:
        tn = max(256, _round_up(tn // 2, 128))

    grid = (pl.cdiv(N, tm), pl.cdiv(F, tn))

    # Advisory cost: s streamed once (block index constant in j), xs re-read
    # per row tile, output written once.
    flops = 2 * N * K * F
    bytes_accessed = (
        s.size * s.dtype.itemsize
        + xs.size * 4 * grid[0]
        + N * F * jnp.dtype(out_dtype).itemsize
    )

    out = pl.pallas_call(
        _unpool_kernel,
        out_shape=jax.ShapeDtypeStruct((N, F), out_dtype),
        grid=grid,
        in_specs=[
            pl.BlockSpec((tm, K), lambda i, j: (i, 0)),   # s row tile (orig dtype)
            pl.BlockSpec((K, tn), lambda i, j: (0, j)),   # (s^T s)^-1 x col tile
        ],
        out_specs=pl.BlockSpec((tm, tn), lambda i, j: (i, j)),
        compiler_params=pltpu.CompilerParams(
            dimension_semantics=("parallel", "parallel"),
            vmem_limit_bytes=32 << 20,
        ),
        cost_estimate=pl.CostEstimate(
            flops=int(flops), transcendentals=0, bytes_accessed=int(bytes_accessed)
        ),
    )(s, xs)

    return out, a


if __name__ == "__main__":
    key = jax.random.PRNGKey(0)
    k_s, k_x, k_a = jax.random.split(key, 3)

    N, K, F = 16, 8, 32          # nodes, clusters, features
    # s given as (K, N) so the transpose branch is exercised.
    s = jax.random.normal(k_s, (K, N), dtype=jnp.float32)
    x = jax.random.normal(k_x, (K, F), dtype=jnp.float32)   # pooled features
    a = jax.random.normal(k_a, (N, N), dtype=jnp.float32)   # adjacency (pass-through)

    x_up, a_out = unpool(x, a, s)
    x_up = jax.block_until_ready(x_up)
    a_out = jax.block_until_ready(a_out)

    # Reference check against plain JAX (same math as the torch module).
    s_tall = s.T
    ref = jnp.matmul(
        jnp.linalg.pinv(s_tall).T, x, precision=lax.Precision.HIGHEST
    )
    assert x_up.shape == (N, F)
    assert jnp.allclose(x_up, ref, atol=2e-3, rtol=2e-3), float(
        jnp.max(jnp.abs(x_up - ref))
    )
    assert jnp.array_equal(a_out, a)

    print("KERNEL_OK")
</pallas_src>

<mosaic_0001>
module attributes {stable_mosaic.version = 11 : i64} {
  func.func @_unpool_kernel(%arg0: i32, %arg1: i32, %arg2: memref<16x8xf32, #tpu.memory_space<vmem>>, %arg3: memref<8x32xf32, #tpu.memory_space<vmem>>, %arg4: memref<16x32xf32, #tpu.memory_space<vmem>>) attributes {dimension_semantics = [#tpu.dimension_semantics<parallel>, #tpu.dimension_semantics<parallel>], iteration_bounds = array<i64: 1, 1>, scalar_prefetch = 0 : i64, scratch_operands = 0 : i64, tpu.core_type = #tpu.core_type<tc>, window_params = [{transform_indices = @transform_0, window_bounds = array<i64: 16, 8>}, {transform_indices = @transform_1, window_bounds = array<i64: 8, 32>}, {transform_indices = @transform_2, window_bounds = array<i64: 16, 32>}]} {
    %c0 = arith.constant 0 : index
    %c0_0 = arith.constant 0 : index
    %0 = vector.load %arg2[%c0, %c0_0] : memref<16x8xf32, #tpu.memory_space<vmem>>, vector<16x8xf32>
    %c0_1 = arith.constant 0 : index
    %c0_2 = arith.constant 0 : index
    %1 = vector.load %arg3[%c0_1, %c0_2] : memref<8x32xf32, #tpu.memory_space<vmem>>, vector<8x32xf32>
    %cst = arith.constant dense<0.000000e+00> : vector<16x32xf32>
    %2 = tpu.matmul %0, %1, %cst {dimension_numbers = #tpu.dot_dimension_numbers<[1], [0], [0], [1], [0, 0, 1, 1], [], []>} : vector<16x8xf32>, vector<8x32xf32>, vector<16x32xf32> -> vector<16x32xf32>
    %c0_3 = arith.constant 0 : index
    %c0_4 = arith.constant 0 : index
    %3 = vector.load %arg4[%c0_3, %c0_4] : memref<16x32xf32, #tpu.memory_space<vmem>>, vector<16x32xf32>
    tpu.vector_store %arg4[%c0_3, %c0_4], %2 {strides = array<i32>} : memref<16x32xf32, #tpu.memory_space<vmem>>, vector<16x32xf32>,
    return
  }
  func.func @transform_0(%arg0: i32, %arg1: i32) -> (i32, i32) {
    %c0_i32 = arith.constant 0 : i32
    %c0_i32_0 = arith.constant 0 : i32
    return %arg0, %c0_i32 : i32, i32
  }
  func.func @transform_1(%arg0: i32, %arg1: i32) -> (i32, i32) {
    %c0_i32 = arith.constant 0 : i32
    %c0_i32_0 = arith.constant 0 : i32
    return %c0_i32, %arg1 : i32, i32
  }
  func.func @transform_2(%arg0: i32, %arg1: i32) -> (i32, i32) {
    %c0_i32 = arith.constant 0 : i32
    return %arg0, %arg1 : i32, i32
  }
}

</mosaic_0001>

<bundles_post_ra>
// kernel: tpu_custom_call.1
= control target key start
LH: loop header
LB: loop body
LE: loop exit
PB: predicated region body
PF: predicated region fallthrough
CT: control target
= control target key end

     0   :  { %vm15_vm0 = vcmask 64512   ;;  %s128_s0 = inlined_call_operand.vmem [shape: f32[16,8], index: 0, kind: input, shape index: {}]   ;;  %s129_s1 = inlined_call_operand.vmem [shape: f32[8,32], index: 1, kind: input, shape index: {}]   ;;  %s130_s2 = inlined_call_operand.hbm [shape: f32[16,32], index: 2, kind: output, shape index: {}]  }
   0x1   :  { %v14_v0 = vld [vmem:[%s129_s1] sm:$0xff]  ;;  %v13_v2 = vld [vmem:[%s128_s0 + $0x8] sm:$0xff] }
   0x2   :  { %v12_v1 = vld [vmem:[%s128_s0] sm:$0xff]  ;;  %37 = vmatpush.msra.mxu0 %v14_v0  ;;  %68 = vmatpush.msra.mxu1 %v14_v0 }
   0x3   :  { %7 = vsyncpa [#allocation3], 0  ;;  %66 = vmatmul.msk.f32.vlgmr.msra.gmra.mxu0 %vm15_vm0, %v12_v1  ;;  %67 = vmatmul.msk.f32.vlgmr.msra.gmra.mxu1 %vm15_vm0, %v13_v2  ;;  %s98_s15 = smov [#allocation2]   ;;  %s54_s1 = sshll.u32 %s130_s2, 4  ;;  %vm45_vm1 = vcmask 261120   ;;  %s55_s1 = int_to_ptr.hbm [resolvable:$true] %s54_s1 }
   0x4   :  { %s52_s16 = sshll.u32 %s98_s15, 4  ;;  %s99_s19 = smov 128   ;;  %s53_s16 = int_to_ptr.vmem [resolvable:$true] %s52_s16 }
   0x5   :  { %s100_s0 = smov 8  }
  0x80   :  { %v39_v3 = vpop.f32.mrf.mxu0  ;;  %v42_v4 = vpop.f32.mrf.mxu1 }
  0x81   :  { %46 = vst.msk [vmem:[#allocation2] sm:$0xff] %vm45_vm1, %v39_v3 }
  0x82   :  { %47 = vst.msk [vmem:[#allocation2 + $0x8] sm:$0xff] %vm45_vm1, %v42_v4 }
  0x83   :  { %60 = dma.vmem_to_hbm [thread:$0]  %s53_s16, 256, %s55_s1, [#allocation3], %s99_s19, %s99_s19, %s100_s0  }
  0x84   :  { %96 = dma.done.wait [#allocation3], 256  }
  0x85   :  { %97 = vsyncadd [#allocation3], 4294967040 }
  0x86   :  { %65 = vsyncpa [#allocation3], 1 }

</bundles_post_ra>
